<compile_context>
chip_gen: v6e
topology: v6e:2x2x1
jax: 0.10.0
libtpu: 0.0.40
codegen_flags: <defaults>
</compile_context>

<pallas_src>
import functools

import jax
import jax.numpy as jnp
from jax.experimental import pallas as pl
from jax.experimental.pallas import tpu as pltpu


def _conv_block3_kernel(x_ref, w_ref, b_ref, o_ref, col_ref, *,
                        img_w, hwp, nb, cin, cout, lane_chunk):
    # x_ref  : (Cin, nb*HWp)      flattened-spatial input block
    # w_ref  : (Cout, 9*Cin)      folded stacked-tap weights (f32, pre-cast)
    # b_ref  : (Cout, 1)          folded bias (f32, pre-cast)
    # o_ref  : (nb, Cout, HWp)    output block (NCHW-compatible, lane-padded)
    # col_ref: (9*Cin, nb*HWp)    im2col scratch (persists across grid steps)
    f32 = jnp.float32
    nblk = nb * hwp

    # ---- Build the stacked-K im2col scratch ---------------------------------
    # Tap t = dy*3 + dx is the input block shifted left by off = dy*W + dx
    # lanes.  The last `off` lanes are left with stale scratch contents: they
    # only feed output columns that the wrapper crops (h >= Ho or w >= Wo), and
    # the matmul is column-wise independent, so they cannot pollute valid cols.
    for dy in range(3):
        for dx in range(3):
            off = dy * img_w + dx
            r0 = (dy * 3 + dx) * cin
            if off == 0:
                col_ref[r0:r0 + cin, :] = x_ref[...].astype(f32)
            else:
                col_ref[r0:r0 + cin, 0:nblk - off] = x_ref[:, off:nblk].astype(f32)

    w = w_ref[...]        # (Cout, 9*Cin) -- constant index_map, resident
    bias = b_ref[...]     # (Cout, 1)

    # ---- Single stacked-K matmul, lane-chunked epilogue ----------------------
    # One K=9*Cin matmul per chunk keeps accumulation inside the MXU and bounds
    # vreg pressure to (Cout, lane_chunk) live values per chunk.
    for j in range(nb):
        for c0 in range(0, hwp, lane_chunk):
            cw = min(lane_chunk, hwp - c0)
            cols = col_ref[:, j * hwp + c0: j * hwp + c0 + cw]    # (9*Cin, cw)
            acc = jnp.dot(w, cols, preferred_element_type=f32)    # (Cout, cw)
            o_ref[j, :, c0:c0 + cw] = jnp.maximum(acc + bias, 0.0).astype(o_ref.dtype)


def _vmem_capacity_bytes(default=64 * 1024 * 1024):
    try:
        cap = getattr(pltpu.get_tpu_info(), "vmem_capacity_bytes", None)
        if cap:
            return int(cap)
    except Exception:
        pass
    return default


def conv_block3_forward(x_nchw, w3_oihw, bconv3, g1, be1, rm1, rv1,
                        w1_oihw, bconv1, g2, be2, rm2, rv2, eps=1e-5):
    """Eval-mode conv_block3 forward: (N, Cin, H, W) -> (N, Cout, H-2, W-2)."""
    N, Cin, H, W = x_nchw.shape
    Cout = w3_oihw.shape[0]
    assert H >= 3 and W >= 3
    Ho, Wo = H - 2, W - 2
    f32 = jnp.float32

    # ---- Fold conv3x3(+bias) -> BN1 -> conv1x1(+bias) -> BN2 offline ---------
    s1 = (g1 / jnp.sqrt(rv1 + eps)).astype(f32)                      # (C1,)
    b1 = (be1 + s1 * (bconv3 - rm1)).astype(f32)                     # (C1,)
    w1_io = jnp.transpose(w1_oihw[:, :, 0, 0], (1, 0)).astype(f32)   # (C1, C2)
    s2 = (g2 / jnp.sqrt(rv2 + eps)).astype(f32)                      # (C2,)

    w_comb = (s1[:, None] * w1_io) * s2[None, :]                     # (C1, C2)
    b_eff = (s2 * (b1 @ w1_io + bconv1 - rm2) + be2).astype(f32)     # (C2,)

    w3_hwio = jnp.transpose(w3_oihw, (2, 3, 1, 0)).astype(f32)       # (3,3,Cin,C1)
    w_eff = jnp.einsum('hwic,cd->hwid', w3_hwio, w_comb)             # (3,3,Cin,C2)
    # Stacked-K layout: row t*Cin + ci  <->  tap t=dy*3+dx, input channel ci.
    w_stacked = jnp.transpose(w_eff.reshape(9 * Cin, Cout), (1, 0))  # (C2, 9*Cin)
    b_eff = b_eff.reshape(Cout, 1)

    # ---- Layout: channels on sublanes, flattened spatial on lanes -------------
    HW = H * W
    HWp = ((HW + 127) // 128) * 128
    xt = jnp.transpose(x_nchw, (1, 0, 2, 3)).reshape(Cin, N, HW)
    if HWp != HW:
        xt = jnp.pad(xt, ((0, 0), (0, 0), (0, HWp - HW)))
    xt = xt.reshape(Cin, N * HWp)
    # TODO(synk): the transpose/pad above and the crop below are extra HBM
    # passes; a caller supplying channels-first flattened layout removes them.

    # Static validity checks for the shift trick:
    #   shifted reads for kept outputs never cross into the next image,
    max_valid_p = (Ho - 1) * W + (Wo - 1)
    assert max_valid_p + 2 * W + 2 <= HW - 1 < HWp
    #   and stale im2col tail lanes only land on cropped output columns.
    assert HWp - (2 * W + 2) > max_valid_p

    # ---- Block sizing from an explicit per-chip VMEM budget --------------------
    # Per lane of block: input (x2 double-buffer) + output (x2) + im2col scratch.
    bytes_per_lane = 4 * (2 * Cin + 2 * Cout + 9 * Cin)
    vmem_cap = _vmem_capacity_bytes()             # 64 MiB v7x, 128 MiB v5e/v6e
    vmem_budget = min(vmem_cap // 2, 48 * 1024 * 1024)
    nb_budget = max(1, (vmem_budget // bytes_per_lane) // HWp)
    lanes_target = 16384                          # amortize ~0.35us/step overhead
    nb = min(N, nb_budget, max(1, lanes_target // HWp))
    if N >= 2:
        nb = min(nb, N // 2)      # keep >= 2 grid steps so v7x feeds both TCs
    nb = max(nb, 1)
    while N % nb:
        nb -= 1

    # Lane-chunk size for the matmul/epilogue (bound live vregs ~Cout*chunk*4B).
    max_chunk = max(128, min(2048, (16384 // max(Cout, 1)) // 128 * 128))
    lane_chunk = min(HWp, max_chunk)

    vmem_est = bytes_per_lane * nb * HWp + 8 * (Cout * 9 * Cin + Cout)
    vmem_limit = int(min(vmem_cap * 9 // 10,
                         max(vmem_est + (4 << 20), 32 << 20)))

    kernel = functools.partial(_conv_block3_kernel, img_w=W, hwp=HWp, nb=nb,
                               cin=Cin, cout=Cout, lane_chunk=lane_chunk)
    out_pad = pl.pallas_call(
        kernel,
        out_shape=jax.ShapeDtypeStruct((N, Cout, HWp), x_nchw.dtype),
        grid=(N // nb,),
        in_specs=[
            pl.BlockSpec((Cin, nb * HWp), lambda i: (0, i)),
            pl.BlockSpec((Cout, 9 * Cin), lambda i: (0, 0)),
            pl.BlockSpec((Cout, 1), lambda i: (0, 0)),
        ],
        out_specs=pl.BlockSpec((nb, Cout, HWp), lambda i: (i, 0, 0)),
        scratch_shapes=[pltpu.VMEM((9 * Cin, nb * HWp), jnp.float32)],
        compiler_params=pltpu.CompilerParams(
            dimension_semantics=("parallel",),
            vmem_limit_bytes=vmem_limit),
    )(xt, w_stacked, b_eff)

    # Crop lane padding and invalid (h>=Ho or w>=Wo) positions; already NCHW.
    out = out_pad[:, :, :HW].reshape(N, Cout, H, W)[:, :, :Ho, :Wo]
    return out


def _reference(x, w3_oihw, bconv3, g1, be1, rm1, rv1,
               w1_oihw, bconv1, g2, be2, rm2, rv2, eps=1e-5):
    """Pure-JAX eval-mode reference matching the PyTorch module."""
    y = jax.lax.conv_general_dilated(
        x, w3_oihw, (1, 1), "VALID",
        dimension_numbers=("NCHW", "OIHW", "NCHW")) + bconv3[None, :, None, None]
    y = (y - rm1[None, :, None, None]) / jnp.sqrt(rv1 + eps)[None, :, None, None] \
        * g1[None, :, None, None] + be1[None, :, None, None]
    y = jax.lax.conv_general_dilated(
        y, w1_oihw, (1, 1), "VALID",
        dimension_numbers=("NCHW", "OIHW", "NCHW")) + bconv1[None, :, None, None]
    y = (y - rm2[None, :, None, None]) / jnp.sqrt(rv2 + eps)[None, :, None, None] \
        * g2[None, :, None, None] + be2[None, :, None, None]
    return jnp.maximum(y, 0.0)


if __name__ == "__main__":
    N, Cin, H, W = 2, 4, 16, 16
    Cout = 8
    eps = 1e-5

    key = jax.random.PRNGKey(0)
    ks = jax.random.split(key, 14)

    x = jax.random.normal(ks[0], (N, Cin, H, W), jnp.float32)

    # Conv1 (3x3) + BN1 parameters
    w3_oihw = 0.1 * jax.random.normal(ks[1], (Cout, Cin, 3, 3), jnp.float32)
    bconv3 = 0.1 * jax.random.normal(ks[2], (Cout,), jnp.float32)
    g1 = 1.0 + 0.1 * jax.random.normal(ks[3], (Cout,), jnp.float32)
    be1 = 0.1 * jax.random.normal(ks[4], (Cout,), jnp.float32)
    rm1 = 0.1 * jax.random.normal(ks[5], (Cout,), jnp.float32)
    rv1 = jnp.abs(jax.random.normal(ks[6], (Cout,), jnp.float32)) + 0.5

    # Conv2 (1x1) + BN2 parameters
    w1_oihw = 0.1 * jax.random.normal(ks[7], (Cout, Cout, 1, 1), jnp.float32)
    bconv1 = 0.1 * jax.random.normal(ks[8], (Cout,), jnp.float32)
    g2 = 1.0 + 0.1 * jax.random.normal(ks[9], (Cout,), jnp.float32)
    be2 = 0.1 * jax.random.normal(ks[10], (Cout,), jnp.float32)
    rm2 = 0.1 * jax.random.normal(ks[11], (Cout,), jnp.float32)
    rv2 = jnp.abs(jax.random.normal(ks[12], (Cout,), jnp.float32)) + 0.5

    out = conv_block3_forward(x, w3_oihw, bconv3, g1, be1, rm1, rv1,
                              w1_oihw, bconv1, g2, be2, rm2, rv2, eps=eps)
    out = jax.block_until_ready(out)

    ref = _reference(x, w3_oihw, bconv3, g1, be1, rm1, rv1,
                     w1_oihw, bconv1, g2, be2, rm2, rv2, eps=eps)
    ref = jax.block_until_ready(ref)

    assert out.shape == (N, Cout, H - 2, W - 2), out.shape
    assert jnp.allclose(out, ref, atol=1e-4, rtol=1e-4), float(jnp.max(jnp.abs(out - ref)))
    print("KERNEL_OK")
</pallas_src>

<mosaic_0001>
module attributes {stable_mosaic.version = 11 : i64} {
  func.func @_conv_block3_kernel(%arg0: i32, %arg1: memref<4x256xf32, #tpu.memory_space<vmem>>, %arg2: memref<8x36xf32, #tpu.memory_space<vmem>>, %arg3: memref<8x1xf32, #tpu.memory_space<vmem>>, %arg4: memref<1x8x256xf32, #tpu.memory_space<vmem>>, %arg5: memref<36x256xf32, #tpu.memory_space<vmem>>) attributes {dimension_semantics = [#tpu.dimension_semantics<parallel>], iteration_bounds = array<i64: 2>, scalar_prefetch = 0 : i64, scratch_operands = 1 : i64, tpu.core_type = #tpu.core_type<tc>, window_params = [{transform_indices = @transform_0, window_bounds = array<i64: 4, 256>}, {pipeline_mode = #tpu.pipeline_mode<synchronous>, transform_indices = @transform_1, window_bounds = array<i64: 8, 36>}, {pipeline_mode = #tpu.pipeline_mode<synchronous>, transform_indices = @transform_2, window_bounds = array<i64: 8, 1>}, {transform_indices = @transform_3, window_bounds = array<i64: 1, 8, 256>}]} {
    %c0 = arith.constant 0 : index
    %c0_0 = arith.constant 0 : index
    %0 = vector.load %arg1[%c0, %c0_0] : memref<4x256xf32, #tpu.memory_space<vmem>>, vector<4x256xf32>
    %c0_1 = arith.constant 0 : index
    %c0_2 = arith.constant 0 : index
    %1 = vector.load %arg5[%c0_1, %c0_2] : memref<36x256xf32, #tpu.memory_space<vmem>>, vector<4x256xf32>
    tpu.vector_store %arg5[%c0_1, %c0_2], %0 {strides = array<i32>} : memref<36x256xf32, #tpu.memory_space<vmem>>, vector<4x256xf32>,
    %c0_3 = arith.constant 0 : index
    %c1 = arith.constant 1 : index
    %2 = vector.load %arg1[%c0_3, %c1] : memref<4x256xf32, #tpu.memory_space<vmem>>, vector<4x255xf32>
    %c4 = arith.constant 4 : index
    %c0_4 = arith.constant 0 : index
    %3 = vector.load %arg5[%c4, %c0_4] : memref<36x256xf32, #tpu.memory_space<vmem>>, vector<4x255xf32>
    tpu.vector_store %arg5[%c4, %c0_4], %2 {strides = array<i32>} : memref<36x256xf32, #tpu.memory_space<vmem>>, vector<4x255xf32>,
    %c0_5 = arith.constant 0 : index
    %c2 = arith.constant 2 : index
    %4 = vector.load %arg1[%c0_5, %c2] : memref<4x256xf32, #tpu.memory_space<vmem>>, vector<4x254xf32>
    %c8 = arith.constant 8 : index
    %c0_6 = arith.constant 0 : index
    %5 = vector.load %arg5[%c8, %c0_6] : memref<36x256xf32, #tpu.memory_space<vmem>>, vector<4x254xf32>
    tpu.vector_store %arg5[%c8, %c0_6], %4 {strides = array<i32>} : memref<36x256xf32, #tpu.memory_space<vmem>>, vector<4x254xf32>,
    %c0_7 = arith.constant 0 : index
    %c16 = arith.constant 16 : index
    %6 = vector.load %arg1[%c0_7, %c16] : memref<4x256xf32, #tpu.memory_space<vmem>>, vector<4x240xf32>
    %c12 = arith.constant 12 : index
    %c0_8 = arith.constant 0 : index
    %7 = vector.load %arg5[%c12, %c0_8] : memref<36x256xf32, #tpu.memory_space<vmem>>, vector<4x240xf32>
    tpu.vector_store %arg5[%c12, %c0_8], %6 {strides = array<i32>} : memref<36x256xf32, #tpu.memory_space<vmem>>, vector<4x240xf32>,
    %c0_9 = arith.constant 0 : index
    %c17 = arith.constant 17 : index
    %8 = vector.load %arg1[%c0_9, %c17] : memref<4x256xf32, #tpu.memory_space<vmem>>, vector<4x239xf32>
    %c16_10 = arith.constant 16 : index
    %c0_11 = arith.constant 0 : index
    %9 = vector.load %arg5[%c16_10, %c0_11] : memref<36x256xf32, #tpu.memory_space<vmem>>, vector<4x239xf32>
    tpu.vector_store %arg5[%c16_10, %c0_11], %8 {strides = array<i32>} : memref<36x256xf32, #tpu.memory_space<vmem>>, vector<4x239xf32>,
    %c0_12 = arith.constant 0 : index
    %c18 = arith.constant 18 : index
    %10 = vector.load %arg1[%c0_12, %c18] : memref<4x256xf32, #tpu.memory_space<vmem>>, vector<4x238xf32>
    %c20 = arith.constant 20 : index
    %c0_13 = arith.constant 0 : index
    %11 = vector.load %arg5[%c20, %c0_13] : memref<36x256xf32, #tpu.memory_space<vmem>>, vector<4x238xf32>
    tpu.vector_store %arg5[%c20, %c0_13], %10 {strides = array<i32>} : memref<36x256xf32, #tpu.memory_space<vmem>>, vector<4x238xf32>,
    %c0_14 = arith.constant 0 : index
    %c32 = arith.constant 32 : index
    %12 = vector.load %arg1[%c0_14, %c32] : memref<4x256xf32, #tpu.memory_space<vmem>>, vector<4x224xf32>
    %c24 = arith.constant 24 : index
    %c0_15 = arith.constant 0 : index
    %13 = vector.load %arg5[%c24, %c0_15] : memref<36x256xf32, #tpu.memory_space<vmem>>, vector<4x224xf32>
    tpu.vector_store %arg5[%c24, %c0_15], %12 {strides = array<i32>} : memref<36x256xf32, #tpu.memory_space<vmem>>, vector<4x224xf32>,
    %c0_16 = arith.constant 0 : index
    %c33 = arith.constant 33 : index
    %14 = vector.load %arg1[%c0_16, %c33] : memref<4x256xf32, #tpu.memory_space<vmem>>, vector<4x223xf32>
    %c28 = arith.constant 28 : index
    %c0_17 = arith.constant 0 : index
    %15 = vector.load %arg5[%c28, %c0_17] : memref<36x256xf32, #tpu.memory_space<vmem>>, vector<4x223xf32>
    tpu.vector_store %arg5[%c28, %c0_17], %14 {strides = array<i32>} : memref<36x256xf32, #tpu.memory_space<vmem>>, vector<4x223xf32>,
    %c0_18 = arith.constant 0 : index
    %c34 = arith.constant 34 : index
    %16 = vector.load %arg1[%c0_18, %c34] : memref<4x256xf32, #tpu.memory_space<vmem>>, vector<4x222xf32>
    %c32_19 = arith.constant 32 : index
    %c0_20 = arith.constant 0 : index
    %17 = vector.load %arg5[%c32_19, %c0_20] : memref<36x256xf32, #tpu.memory_space<vmem>>, vector<4x222xf32>
    tpu.vector_store %arg5[%c32_19, %c0_20], %16 {strides = array<i32>} : memref<36x256xf32, #tpu.memory_space<vmem>>, vector<4x222xf32>,
    %c0_21 = arith.constant 0 : index
    %c0_22 = arith.constant 0 : index
    %18 = vector.load %arg2[%c0_21, %c0_22] : memref<8x36xf32, #tpu.memory_space<vmem>>, vector<8x36xf32>
    %c0_23 = arith.constant 0 : index
    %c0_24 = arith.constant 0 : index
    %19 = vector.load %arg3[%c0_23, %c0_24] : memref<8x1xf32, #tpu.memory_space<vmem>>, vector<8x1xf32>
    %c0_25 = arith.constant 0 : index
    %c0_26 = arith.constant 0 : index
    %20 = vector.load %arg5[%c0_25, %c0_26] : memref<36x256xf32, #tpu.memory_space<vmem>>, vector<36x256xf32>
    %cst = arith.constant dense<0.000000e+00> : vector<8x256xf32>
    %21 = tpu.matmul %18, %20, %cst {dimension_numbers = #tpu.dot_dimension_numbers<[1], [0], [0], [1], [0, 0, 1, 1], [], []>} : vector<8x36xf32>, vector<36x256xf32>, vector<8x256xf32> -> vector<8x256xf32>
    %22 = vector.broadcast %19 : vector<8x1xf32> to vector<8x256xf32>
    %23 = arith.addf %21, %22 : vector<8x256xf32>
    %cst_27 = arith.constant 0.000000e+00 : f32
    %24 = vector.broadcast %cst_27 : f32 to vector<8x256xf32>
    %25 = arith.maximumf %23, %24 : vector<8x256xf32>
    %c0_28 = arith.constant 0 : index
    %c0_29 = arith.constant 0 : index
    %c0_30 = arith.constant 0 : index
    %26 = vector.load %arg4[%c0_28, %c0_29, %c0_30] : memref<1x8x256xf32, #tpu.memory_space<vmem>>, vector<1x8x256xf32>
    %27 = vector.shape_cast %26 : vector<1x8x256xf32> to vector<8x256xf32>
    %28 = vector.shape_cast %25 : vector<8x256xf32> to vector<1x8x256xf32>
    tpu.vector_store %arg4[%c0_28, %c0_29, %c0_30], %28 {strides = array<i32>} : memref<1x8x256xf32, #tpu.memory_space<vmem>>, vector<1x8x256xf32>,
    return
  }
  func.func @transform_0(%arg0: i32) -> (i32, i32) {
    %c0_i32 = arith.constant 0 : i32
    %c0_i32_0 = arith.constant 0 : i32
    return %c0_i32, %arg0 : i32, i32
  }
  func.func @transform_1(%arg0: i32) -> (i32, i32) {
    %c0_i32 = arith.constant 0 : i32
    %c0_i32_0 = arith.constant 0 : i32
    %c0_i32_1 = arith.constant 0 : i32
    return %c0_i32, %c0_i32_0 : i32, i32
  }
  func.func @transform_2(%arg0: i32) -> (i32, i32) {
    %c0_i32 = arith.constant 0 : i32
    %c0_i32_0 = arith.constant 0 : i32
    %c0_i32_1 = arith.constant 0 : i32
    return %c0_i32, %c0_i32_0 : i32, i32
  }
  func.func @transform_3(%arg0: i32) -> (i32, i32, i32) {
    %c0_i32 = arith.constant 0 : i32
    %c0_i32_0 = arith.constant 0 : i32
    %c0_i32_1 = arith.constant 0 : i32
    return %arg0, %c0_i32, %c0_i32_0 : i32, i32, i32
  }
}

</mosaic_0001>

<bundles_post_ra>
// kernel: tpu_custom_call.1
= control target key start
LH: loop header
LB: loop body
LE: loop exit
PB: predicated region body
PF: predicated region fallthrough
CT: control target
= control target key end

     0   :  { %8 = vsyncpa [#allocation4], 0  ;;  %s846_s0 = inlined_call_operand.hbm [shape: f32[4,512], index: 0, kind: input, shape index: {}]   ;;  %s847_s1 = inlined_call_operand.vmem [shape: f32[8,36], index: 1, kind: input, shape index: {}]   ;;  %s848_s2 = inlined_call_operand.vmem [shape: f32[8,1], index: 2, kind: input, shape index: {}]   ;;  %s849_s3 = inlined_call_operand.hbm [shape: f32[2,8,256], index: 3, kind: output, shape index: {}]  }
   0x1   :  { %10 = vsyncpa [#allocation4 + $0x1], 0 }
   0x2   :  { %11 = vsyncpa [#allocation5], 0 }
   0x3   :  { %13 = vsyncpa [#allocation5 + $0x1], 0  ;;  %s698_s12 = smov 0   ;;  %s700_s13 = smov 0  }
   0x4   :  { %s702_s14 = smov 0   ;;  %s704_s15 = smov 0  }
   0x5 LB: > { %s719_s16 = sadd.s32 4294967295, %s664_s15   ;;  %s494_s17 = sadd.s32 4294967294, %s664_s15   ;;  %s664_s15 = sphi %s704_s15, %s866_s15   ;;  %s660_s14 = sphi %s702_s14, %s865_s14   ;;  %s656_s13 = sphi %s700_s13, %s864_s13   ;;  %s652_s12 = sphi %s698_s12, %s863_s12  }
   0x6   : > { %s723_s18 = sadd.s32 1, %s664_s15   ;;  %s26_s19 = sadd.s32 1, %s660_s14 }
   0x7   : > { %s23_s20 = ssub.s32 %s664_s15, %s723_s18  ;;  %p33_p0 = scmp.ne.s32.totalorder %s660_s14, %s656_s13 }
   0x8   : > { %p24_p1 = scmp.eq.s32.totalorder %s23_s20, 0  ;;  %p34_p2 = scmp.eq.s32.totalorder %s664_s15, 0 }
   0x9   : > { %p39_p3 = scmp.ne.s32.totalorder %s656_s13, %s652_s12  ;;  %p40_p4 = scmp.eq.s32.totalorder %s719_s16, 0 }
   0xa   : > { %s735_s21 = scalar_select %p24_p1, %s660_s14, %s26_s19  }
   0xb   : > { %p737_p5 = por %p34_p2, %p33_p0  ;;  %p741_p6 = por %p40_p4, %p39_p3 }
   0xc   : > { %p105_p7 = scmp.eq.s32.totalorder %s719_s16, 1  ;;  %p111_p8 = scmp.eq.s32.totalorder %s494_s17, 1 }
   0xd   : > { %s853_s23 = scalar_select %p741_p6, 1, 0 }
   0xe   : > { %p525_p10 = scmp.lt.s32.totalorder %s664_s15, 2  ;;  %p748_p11 = por %p105_p7, %p33_p0 }
   0xf   : > { %p752_p12 = por %p111_p8, %p39_p3  ;;  %s137_s26 = sand.u32 1, %s660_s14  }
  0x10   : > { %s854_s24 = scalar_select %p748_p11, 1, 0 }
  0x11   : > { %s855_s25 = scalar_select %p752_p12, 1, 0 }
  0x12   : > { %s511_s27 = sshll.u32 %s664_s15, 7  ;;  %s497_s28 = sshll.u32 %s137_s26, 3 }
  0x13   : > { %s761_s4 = scalar_lea.hbm %s846_s0, %s511_s27  ;;  %s141_s5 = scalar_lea.vmem [#allocation3], %s497_s28 }
  0x14   : > { %s149_s6 = sshll.u32 %s141_s5, 4  ;;  %p765_p13 = pnand %p525_p10, %p737_p5  ;;  %s769_s6 = int_to_ptr.vmem [resolvable:$true] %s149_s6 }
  0x15   : > { %s138_s8 = scalar_lea.sflag [#allocation4], %s137_s26  ;;  %s572_s9 = scalar_lea.hbm %s761_s4, 128 }
  0x16   : > { %p573_p2 = scmp.ne.s32.totalorder %s761_s4, %s572_s9  ;;  %p574_p3 = pneg %p765_p13 }
  0x17   : > { %s577_s17 = scalar_lea.hbm %s846_s0, 256  ;;  %p578_p5 = scmp.lt.s32.totalorder %s761_s4, %s846_s0 }
  0x18   : > { %p575_p4 = pnand %p574_p3, %p573_p2  ;;  %p579_p8 = scmp.lt.s32.totalorder %s577_s17, %s572_s9 }
  0x1a   : > { %p576_p7 = pneg %p575_p4  ;;  %p580_p10 = por %p579_p8, %p578_p5 }
  0x1c   : > { %p581_p9 = pnand %p580_p10, %p576_p7 }
  0x1e   : > { %584 = shalt.err (!%p581_p9)
}
  0x1f   : > { %s585_s22 = scalar_lea.vmem %s769_s6, 128  ;;  %s666_s26 = smov [#allocation3]  }
  0x20   : > { %p586_p0 = scmp.ne.s32.totalorder %s769_s6, %s585_s22  ;;  %s590_s27 = sshll.u32 %s666_s26, 4  ;;  %s591_s27 = int_to_ptr.vmem [resolvable:$false] %s590_s27 }
  0x21   : > { %s592_s28 = scalar_lea.vmem %s591_s27, 256  ;;  %p593_p4 = scmp.lt.s32.totalorder %s769_s6, %s591_s27 }
  0x22   : > { %p588_p1 = pnand %p586_p0, %p574_p3  ;;  %p594_p12 = scmp.lt.s32.totalorder %s592_s28, %s585_s22 }
  0x24   : > { %p589_p2 = pneg %p588_p1  ;;  %p595_p11 = por %p594_p12, %p593_p4 }
  0x26   : > { %p596_p6 = pnand %p595_p11, %p589_p2 }
  0x28   : > { %599 = shalt.err (!%p596_p6)
}
  0x29   : > { %520 = dma.hbm_to_vmem [thread:$0]  (!%p765_p13), %s761_s4, 128, %s769_s6, %s138_s8  }
  0x2a   : > { %p857_p9 = scmp.lt.s32.totalorder %s664_s15, 3  ;;  %p858_p7 = scmp.ge.s32.totalorder %s664_s15, 1 }
  0x2c   : > { %p155_p0 = pnand %p858_p7, %p857_p9 }
  0x2d   : > { %s796_s29 = sand.u32 (!%p155_p0), 1, %s656_s13   ;;  %p859_p6 = scmp.ne.s32.totalorder (!%p155_p0), %s853_s23, 0 }
  0x2e   : > { %158 = sbr.rel (%p155_p0) target bundleno = 418 (0x1a2), region = 32  ;;  %s501_s30 = sshll.u32 (!%p155_p0), %s796_s29, 3 }
  0x2f   : > { %s161_s5 = scalar_lea.sflag (!%p155_p0), [#allocation4], %s796_s29  ;;  %s164_s9 = scalar_lea.vmem (!%p155_p0), [#allocation3], %s501_s30 }
  0x33   : > { %643 = dma.done.wait (%p859_p6), %s161_s5, 128  }
  0x34   : > { %645 = vsyncadd (%p859_p6), %s161_s5, 4294967168  ;;  %v292_v0 = vld [vmem:[%s164_s9] sm:$0xff]  ;;  %s667_s4 = smov 94   ;;  %s668_s6 = smov 96   ;;  %v674_v3 = vmov 0.0   ;;  %v675_v4 = vmov 0  }
  0x35   : > { %295 = vrot.lane.b32.xlu0 %v292_v0, %s667_s4  ;;  %v294_v1 = vcombine.high %v292_v0, %v292_v0  ;;  %267 = vrot.lane.b32.xlu1 %v292_v0, %s668_s6  ;;  %192 = vst [vmem:[#allocation2] sm:$0xf] %v292_v0  ;;  %v280_v2 = vcombine.low %v292_v0, %v292_v0  ;;  %s669_s7 = smov 95   ;;  %s670_s8 = smov 111   ;;  %v307_v5 = vld [vmem:[%s848_s2] sm:$0xff]  ;;  %vm299_vm0 = vcmask 769024  }
  0x36   : > { %s671_s10 = smov 110   ;;  %s672_s23 = smov 126   ;;  %398 = vmatprep.mubr.f32.mxu0 %v674_v3  ;;  %569 = vset.pattern.permute.xlu0 %v675_v4  ;;  %vm304_vm1 = vcmask 764928   ;;  %vm290_vm2 = vcmask 777220   ;;  %vm285_vm3 = vcmask 777216   ;;  %vm271_vm4 = vcmask 785408  }
  0x37   : > { %193 = vst [vmem:[#allocation2 + $0x8] sm:$0xf] %v294_v1  ;;  %s673_s11 = smov 112   ;;  %s676_s17 = smov 127   ;;  %vm276_vm5 = vcmask 781312   ;;  %vm243_vm6 = vcmask 908288  }
  0x38   : > { %vm248_vm7 = vcmask 904192   ;;  %vm327_vm8 = vcmask 1043456   ;;  %vm257_vm9 = vcmask 900096   ;;  %vm262_vm10 = vcmask 900100   ;;  %v306_v39 = vld [vmem:[%s847_s1] sm:$0xff]  ;;  %s502_s27 = sshll.u32 %s796_s29, 4 }
  0x39   : > { %297 = vrot.lane.b32.xlu0 %v294_v1, %s667_s4  ;;  %283 = vrot.lane.b32.xlu1 %v292_v0, %s669_s7  ;;  %vm215_vm11 = vcmask 1031168   ;;  %vm220_vm12 = vcmask 1027072   ;;  %vm229_vm13 = vcmask 916480   ;;  %vm234_vm14 = vcmask 916484   ;;  %s512_s28 = sshll.u32 %s719_s16, 8  ;;  %s186_s30 = scalar_lea.vmem [#allocation6], %s502_s27 }
  0x3a   : > { %vm206_vm15 = vcmask 1039364   ;;  %s424_s5 = sshll.u32 %s186_s30, 4  ;;  %p860_p12 = scmp.ne.s32.totalorder %s854_s24, 0  ;;  %s425_s5 = int_to_ptr.vmem [resolvable:$true] %s424_s5 }
  0x3d   : > { %281 = vrot.lane.b32.xlu0 %v280_v2, %s669_s7  ;;  %269 = vrot.lane.b32.xlu1 %v294_v1, %s668_s6  ;;  %s422_s6 = scalar_lea.hbm %s849_s3, %s512_s28  ;;  %s410_s7 = scalar_lea.sflag [#allocation5], %s796_s29 }
  0x41   : > { %239 = vrot.lane.b32.xlu0 %v292_v0, %s670_s8  ;;  %241 = vrot.lane.b32.xlu1 %v294_v1, %s670_s8  ;;  %s600_s8 = scalar_lea.vmem %s425_s5, 256 }
  0x42   : > { %p601_p11 = scmp.ne.s32.totalorder %s425_s5, %s600_s8 }
  0x44   : > { %p602_p13 = pnand %p601_p11, %p860_p12 }
  0x45   : > { %253 = vrot.lane.b32.xlu0 %v280_v2, %s671_s10  ;;  %255 = vrot.lane.b32.xlu1 %v292_v0, %s671_s10  ;;  %s677_s10 = smov [#allocation6]  }
  0x46   : > { %p603_p1 = pneg %p602_p13  ;;  %s604_s16 = sshll.u32 %s677_s10, 4  ;;  %s605_s16 = int_to_ptr.vmem [resolvable:$false] %s604_s16 }
  0x47   : > { %p607_p3 = scmp.lt.s32.totalorder %s425_s5, %s605_s16 }
  0x49   : > { %211 = vrot.lane.b32.xlu0 %v292_v0, %s672_s23  ;;  %213 = vrot.lane.b32.xlu1 %v294_v1, %s672_s23  ;;  %s606_s23 = scalar_lea.vmem %s605_s16, 512 }
  0x4a   : > { %p608_p5 = scmp.lt.s32.totalorder %s606_s23, %s600_s8 }
  0x4c   : > { %p609_p8 = por %p608_p5, %p607_p3 }
  0x4d   : > { %225 = vrot.lane.b32.xlu0 %v280_v2, %s673_s11  ;;  %227 = vrot.lane.b32.xlu1 %v292_v0, %s673_s11 }
  0x4e   : > { %p610_p10 = pnand %p609_p8, %p603_p1 }
  0x51   : > { %199 = vrot.lane.b32.xlu1 %v292_v0, %s676_s17  ;;  %197 = vrot.lane.b32.xlu0 %v280_v2, %s676_s17 }
  0x55   : > { %320 = vperm.xlu0 %569, %v307_v5  }
  0xa7   : > { %v296_v6 = vpop.permute.xlu0 %295  ;;  %v268_v7 = vpop.permute.xlu1 %267 }
  0xab   : > { %v298_v8 = vpop.permute.xlu0 %297  ;;  %v284_v9 = vpop.permute.xlu1 %283 }
  0xac   : > { %v300_v10 = vsel %vm299_vm0, %v296_v6, %v298_v8  ;;  %305 = vst.msk [vmem:[#allocation2 + $0x48] sm:$0xf] %vm304_vm1, %v298_v8  ;;  %vm201_vm0 = vcmask 1039360   ;;  %vm323_vm1 = vcmask 293888  }
  0xad   : > { %291 = vst.msk [vmem:[#allocation2 + $0x38] sm:$0xf0] %vm290_vm2, %v284_v9  ;;  %303 = vst [vmem:[#allocation2 + $0x40] sm:$0xf] %v300_v10 }
  0xaf   : > { %v282_v11 = vpop.permute.xlu0 %281  ;;  %v270_v12 = vpop.permute.xlu1 %269 }
  0xb0   : > { %v286_v13 = vsel %vm285_vm3, %v282_v11, %v284_v9  ;;  %v272_v14 = vsel %vm271_vm4, %v268_v7, %v270_v12  ;;  %277 = vst.msk [vmem:[#allocation2 + $0x38] sm:$0xf] %vm276_vm5, %v270_v12 }
  0xb1   : > { %289 = vst [vmem:[#allocation2 + $0x30] sm:$0xf0] %v286_v13  ;;  %275 = vst [vmem:[#allocation2 + $0x30] sm:$0xf] %v272_v14 }
  0xb3   : > { %v240_v15 = vpop.permute.xlu0 %239  ;;  %v242_v16 = vpop.permute.xlu1 %241  ;;  %v317_v17 = vld [vmem:[#allocation2 + $0x48] sm:$0xf] }
  0xb4   : > { %v244_v18 = vsel %vm243_vm6, %v240_v15, %v242_v16  ;;  %249 = vst.msk [vmem:[#allocation2 + $0x28] sm:$0xf] %vm248_vm7, %v242_v16  ;;  %503 = vmatprep.subr.msk.mxu0 %vm327_vm8, %v317_v17  ;;  %v316_v19 = vld [vmem:[#allocation2 + $0x40] sm:$0xf] }
  0xb5   : > { %247 = vst [vmem:[#allocation2 + $0x20] sm:$0xf] %v244_v18  ;;  %504 = vmatpush1.msk.msra.mxu0 %vm327_vm8, %v316_v19 }
  0xb7   : > { %v254_v20 = vpop.permute.xlu0 %253  ;;  %v256_v21 = vpop.permute.xlu1 %255  ;;  %v315_v22 = vld [vmem:[#allocation2 + $0x38] sm:$0xff] }
  0xb8   : > { %v258_v23 = vsel %vm257_vm9, %v254_v20, %v256_v21  ;;  %263 = vst.msk [vmem:[#allocation2 + $0x28] sm:$0xf0] %vm262_vm10, %v256_v21  ;;  %358 = vmatprep.subr.mxu0 %v315_v22  ;;  %v314_v24 = vld [vmem:[#allocation2 + $0x30] sm:$0xff] }
  0xb9   : > { %261 = vst [vmem:[#allocation2 + $0x20] sm:$0xf0] %v258_v23  ;;  %359 = vmatpush1.msra.mxu0 %v314_v24 }
  0xbb   : > { %v212_v25 = vpop.permute.xlu0 %211  ;;  %v214_v26 = vpop.permute.xlu1 %213 }
  0xbc   : > { %v216_v27 = vsel %vm215_vm11, %v212_v25, %v214_v26  ;;  %221 = vst.msk [vmem:[#allocation2 + $0x18] sm:$0xf] %vm220_vm12, %v214_v26 }
  0xbd   : > { %219 = vst [vmem:[#allocation2 + $0x10] sm:$0xf] %v216_v27 }
  0xbf   : > { %v226_v28 = vpop.permute.xlu0 %225  ;;  %v228_v29 = vpop.permute.xlu1 %227  ;;  %v313_v30 = vld [vmem:[#allocation2 + $0x28] sm:$0xff] }
  0xc0   : > { %v230_v31 = vsel %vm229_vm13, %v226_v28, %v228_v29  ;;  %235 = vst.msk [vmem:[#allocation2 + $0x18] sm:$0xf0] %vm234_vm14, %v228_v29  ;;  %360 = vmatprep.subr.mxu0 %v313_v30  ;;  %v312_v32 = vld [vmem:[#allocation2 + $0x20] sm:$0xff] }
  0xc1   : > { %233 = vst [vmem:[#allocation2 + $0x10] sm:$0xf0] %v230_v31  ;;  %361 = vmatpush1.msra.mxu0 %v312_v32 }
  0xc3   : > { %v200_v33 = vpop.permute.xlu1 %199  ;;  %v198_v34 = vpop.permute.xlu0 %197 }
  0xc4   : > { %207 = vst.msk [vmem:[#allocation2 + $0x8] sm:$0xf0] %vm206_vm15, %v200_v33  ;;  %v202_v35 = vsel %vm201_vm0, %v198_v34, %v200_v33 }
  0xc5   : > { %205 = vst [vmem:[#allocation2] sm:$0xf0] %v202_v35 }
  0xc7   : > { %v311_v36 = vld [vmem:[#allocation2 + $0x18] sm:$0xff] }
  0xc8   : > { %362 = vmatprep.subr.mxu0 %v311_v36  ;;  %v310_v37 = vld [vmem:[#allocation2 + $0x10] sm:$0xff] }
  0xc9   : > { %363 = vmatpush1.msra.mxu0 %v310_v37 }
  0xcb   : > { %v309_v38 = vld [vmem:[#allocation2 + $0x8] sm:$0xff] }
  0xcc   : > { %364 = vmatprep.subr.mxu0 %v309_v38  ;;  %v308_v40 = vld [vmem:[#allocation2] sm:$0xff] }
  0xcd   : > { %365 = vmatpush1.msra.mxu0 %v308_v40 }
  0xce   : > { %505 = vmatmul.mubr.msk.f32.vlgmr.msra.gmra.mxu0 %vm323_vm1, %v306_v39 }
  0xd0   : > { %v321_v41 = vpop.permute.xlu0 %320 }
 0x18e   : > { %v400_v42 = vpop.f32.mrf.mxu0 }
 0x18f   : > { %v401_v43 = vadd.f32 %v400_v42, %v321_v41 }
 0x190   : > { %v402_v44 = vpop.f32.mrf.mxu0 }
 0x191   : > { %v405_v45 = vmax.f32 %v401_v43, 0.0  ;;  %v403_v46 = vadd.f32 %v402_v44, %v321_v41 }
 0x193   : > { %407 = vst [vmem:[%s186_s30] sm:$0xff] %v405_v45  ;;  %v406_v47 = vmax.f32 %v403_v46, 0.0 }
 0x195   : > { %408 = vst [vmem:[%s186_s30 + $0x8] sm:$0xff] %v406_v47 }
 0x196   : > { %613 = shalt.err (!%p610_p10)
}
 0x197   : > { %s614_s11 = scalar_lea.hbm %s422_s6, 256  ;;  %s618_s19 = scalar_lea.hbm %s849_s3, 512 }
 0x198   : > { %p615_p2 = scmp.ne.s32.totalorder %s422_s6, %s614_s11  ;;  %p619_p7 = scmp.lt.s32.totalorder %s422_s6, %s849_s3 }
 0x199   : > { %p620_p0 = scmp.lt.s32.totalorder %s618_s19, %s614_s11 }
 0x19a   : > { %p616_p4 = pnand %p615_p2, %p860_p12 }
 0x19b   : > { %p621_p6 = por %p620_p0, %p619_p7 }
 0x19c   : > { %p617_p9 = pneg %p616_p4 }
 0x19e   : > { %p622_p11 = pnand %p621_p6, %p617_p9 }
 0x1a0   : > { %625 = shalt.err (!%p622_p11)
}
 0x1a1   : > { %515 = dma.vmem_to_hbm [thread:$0]  (%p860_p12), %s425_s5, 256, %s422_s6, %s410_s7  }
 0x1a2 PF: > { %s436_s26 = sand.u32 1, %s652_s12   ;;  %p861_p13 = scmp.ne.s32.totalorder %s855_s25, 0 }
 0x1a3   : > { %p862_p1 = scmp.ge.s32.totalorder %s664_s15, 2  ;;  %s437_s27 = scalar_lea.sflag [#allocation5], %s436_s26 }
 0x1a5   : > { %p522_p3 = pnand %p862_p1, %p861_p13 }
 0x1a7   : > { %p523_p5 = pneg %p522_p3 }
 0x1a9   : > { %647 = dma.done.wait (%p523_p5), %s437_s27, 256  }
 0x1aa   : > { %649 = vsyncadd (%p523_p5), %s437_s27, 4294967040  ;;  %p16_p8 = scmp.ge.s32.totalorder %s723_s18, 4   ;;  %s863_s12 = smov %s656_s13 }
 0x1ab   : > { %s864_s13 = smov %s660_s14  ;;  %s865_s14 = smov %s735_s21 }
 0x1ac   : > { %s866_s15 = smov %s723_s18  ;;  %18 = sbr.rel (!%p16_p8) target bundleno = 5 (0x5), region = 77 }
 0x1b1   :  { %442 = vsyncpa [#allocation4], 1 }
 0x1b2   :  { %444 = vsyncpa [#allocation4 + $0x1], 1 }
 0x1b3   :  { %445 = vsyncpa [#allocation5], 1 }
 0x1b4   :  { %447 = vsyncpa [#allocation5 + $0x1], 1 }

</bundles_post_ra>
